<compile_context>
chip_gen: v5e
topology: v5e:2x2
jax: 0.10.0
libtpu: 0.0.40
codegen_flags: <defaults>
</compile_context>

<pallas_src>
import functools

import jax
import jax.numpy as jnp
from jax.experimental import pallas as pl
from jax.experimental.pallas import tpu as pltpu

EPS = 1e-5


# ---------------------------------------------------------------------------
# Fused kernel: trunk MLP + all branch heads + per-branch softmax/renorm
# ---------------------------------------------------------------------------
def _fused_actor_kernel(obs_ref, nw1_ref, nb1_ref, nw2_ref, nb2_ref,
                        bw1_ref, bb1_ref, bw2_ref, bb2_ref, out_ref, *, nvec):
    # Trunk: Linear -> ReLU -> Linear -> ReLU
    h = jnp.dot(obs_ref[...], nw1_ref[...], preferred_element_type=jnp.float32)
    h = jnp.maximum(h + nb1_ref[...], 0.0)
    embed = jnp.dot(h, nw2_ref[...], preferred_element_type=jnp.float32)
    embed = jnp.maximum(embed + nb2_ref[...], 0.0)

    # All branch first layers in one matmul: [B, n_branch*hidden]
    h_all = jnp.dot(embed, bw1_ref[...], preferred_element_type=jnp.float32)
    h_all = jnp.maximum(h_all + bb1_ref[...], 0.0)

    # All branch second layers via block-diagonal weight: [B, sum(nvec)]
    logit_all = jnp.dot(h_all, bw2_ref[...], preferred_element_type=jnp.float32)
    logit_all = logit_all + bb2_ref[...]

    # Per-branch softmax + eps + renorm, done with lane masks over the
    # concatenated logits (n_branch is static -> Python-unrolled).
    col = jax.lax.broadcasted_iota(jnp.int32, logit_all.shape, dimension=1)
    out = jnp.zeros_like(logit_all)
    start = 0
    for n in nvec:
        mask = (col >= start) & (col < start + n)
        lg = jnp.where(mask, logit_all, -1e30)
        m = jnp.max(lg, axis=-1, keepdims=True)
        ex = jnp.where(mask, jnp.exp(lg - m), 0.0)
        s = jnp.sum(ex, axis=-1, keepdims=True)
        p = ex * pl.reciprocal(s)
        # sum(softmax + eps) == 1 + n*eps (to ~1 ulp): fold the second
        # renormalization into a compile-time constant.
        p = (p + EPS) * (1.0 / (1.0 + n * EPS))
        out = jnp.where(mask, p, out)
        start += n
    out_ref[...] = out


# ---------------------------------------------------------------------------
# Parameter packing (done once): fuse branch weights for wide MXU passes
# ---------------------------------------------------------------------------
def pack_params(params):
    hidden = params["net_w2"].shape[1]
    nvec = tuple(int(br["w2"].shape[1]) for br in params["branches"])
    total = sum(nvec)

    bw1 = jnp.concatenate([br["w1"] for br in params["branches"]], axis=1)
    bb1 = jnp.concatenate([br["b1"] for br in params["branches"]], axis=1)

    # Block-diagonal second-layer weight: row block i maps branch i's hidden
    # features to its own logit slice only.
    blocks = []
    start = 0
    for br, n in zip(params["branches"], nvec):
        left = jnp.zeros((hidden, start), jnp.float32)
        right = jnp.zeros((hidden, total - start - n), jnp.float32)
        blocks.append(jnp.concatenate([left, br["w2"], right], axis=1))
        start += n
    bw2 = jnp.concatenate(blocks, axis=0)
    bb2 = jnp.concatenate([br["b2"] for br in params["branches"]], axis=1)

    return {
        "net_w1": params["net_w1"], "net_b1": params["net_b1"],
        "net_w2": params["net_w2"], "net_b2": params["net_b2"],
        "bw1": bw1, "bb1": bb1, "bw2": bw2, "bb2": bb2,
        "nvec": nvec,
    }


# ---------------------------------------------------------------------------
# Wrapper: full forward pass (single pallas_call)
# ---------------------------------------------------------------------------
def multi_categorical_actor_forward(obs, packed):
    B, obs_dim = obs.shape
    nvec = packed["nvec"]
    total = sum(nvec)

    # Batch tiling: small batches go in one step; large batches are tiled so the
    # pipeline stays fed and v7x's two TensorCores split the (parallel) axis.
    block_rows = B if B <= 512 else 512
    grid = (pl.cdiv(B, block_rows),)

    def resident(arr):
        # Whole-array weight block, grid-invariant -> stays resident in VMEM.
        return pl.BlockSpec(arr.shape, lambda i: (0, 0))

    kernel = functools.partial(_fused_actor_kernel, nvec=nvec)
    return pl.pallas_call(
        kernel,
        out_shape=jax.ShapeDtypeStruct((B, total), jnp.float32),
        grid_spec=pltpu.PrefetchScalarGridSpec(
            num_scalar_prefetch=0,
            grid=grid,
            in_specs=[
                pl.BlockSpec((block_rows, obs_dim), lambda i: (i, 0)),
                resident(packed["net_w1"]), resident(packed["net_b1"]),
                resident(packed["net_w2"]), resident(packed["net_b2"]),
                resident(packed["bw1"]), resident(packed["bb1"]),
                resident(packed["bw2"]), resident(packed["bb2"]),
            ],
            out_specs=pl.BlockSpec((block_rows, total), lambda i: (i, 0)),
        ),
        compiler_params=pltpu.CompilerParams(
            dimension_semantics=("parallel",)),
    )(obs, packed["net_w1"], packed["net_b1"], packed["net_w2"],
      packed["net_b2"], packed["bw1"], packed["bb1"], packed["bw2"],
      packed["bb2"])


# ---------------------------------------------------------------------------
# Deterministic parameter init + pure-JAX reference
# ---------------------------------------------------------------------------
def init_params(key, obs_dim, hidden, nvec):
    keys = jax.random.split(key, 4 + 4 * len(nvec))
    scale = 0.1
    params = {
        "net_w1": scale * jax.random.normal(keys[0], (obs_dim, hidden), jnp.float32),
        "net_b1": scale * jax.random.normal(keys[1], (1, hidden), jnp.float32),
        "net_w2": scale * jax.random.normal(keys[2], (hidden, hidden), jnp.float32),
        "net_b2": scale * jax.random.normal(keys[3], (1, hidden), jnp.float32),
        "branches": [],
    }
    for i, n in enumerate(nvec):
        k = keys[4 + 4 * i: 8 + 4 * i]
        params["branches"].append({
            "w1": scale * jax.random.normal(k[0], (hidden, hidden), jnp.float32),
            "b1": scale * jax.random.normal(k[1], (1, hidden), jnp.float32),
            "w2": scale * jax.random.normal(k[2], (hidden, n), jnp.float32),
            "b2": scale * jax.random.normal(k[3], (1, n), jnp.float32),
        })
    return params


def reference_forward(obs, params):
    h = jnp.maximum(obs @ params["net_w1"] + params["net_b1"], 0.0)
    embed = jnp.maximum(h @ params["net_w2"] + params["net_b2"], 0.0)
    outs = []
    for br in params["branches"]:
        hh = jnp.maximum(embed @ br["w1"] + br["b1"], 0.0)
        logit = hh @ br["w2"] + br["b2"]
        p = jax.nn.softmax(logit, axis=-1) + EPS
        p = p / jnp.sum(p, axis=-1, keepdims=True)
        outs.append(p)
    return jnp.concatenate(outs, axis=-1)


if __name__ == "__main__":
    key = jax.random.PRNGKey(0)
    k_param, k_obs = jax.random.split(key)

    batch = 4
    obs_dim = 10
    hidden = 32          # sizes[-1]
    nvec = [5, 7, 4]     # poi_branchs[...].nvec, n_branch = 3

    params = init_params(k_param, obs_dim, hidden, nvec)
    obs = jax.random.normal(k_obs, (batch, obs_dim), jnp.float32)

    packed = pack_params(params)
    out = multi_categorical_actor_forward(obs, packed)
    out = jax.block_until_ready(out)

    ref = reference_forward(obs, params)
    assert out.shape == (batch, sum(nvec)), out.shape
    assert jnp.allclose(out, ref, atol=1e-5, rtol=1e-5), "mismatch vs reference"
    # each branch's probabilities should (re)normalize to 1
    start = 0
    for n in nvec:
        s = jnp.sum(out[:, start:start + n], axis=-1)
        assert jnp.allclose(s, 1.0, atol=1e-5)
        start += n

    print("KERNEL_OK")
</pallas_src>

<mosaic_0001>
module attributes {stable_mosaic.version = 11 : i64} {
  func.func @_fused_actor_kernel(%arg0: i32, %arg1: memref<4x10xf32, #tpu.memory_space<vmem>>, %arg2: memref<10x32xf32, #tpu.memory_space<vmem>>, %arg3: memref<1x32xf32, #tpu.memory_space<vmem>>, %arg4: memref<32x32xf32, #tpu.memory_space<vmem>>, %arg5: memref<1x32xf32, #tpu.memory_space<vmem>>, %arg6: memref<32x96xf32, #tpu.memory_space<vmem>>, %arg7: memref<1x96xf32, #tpu.memory_space<vmem>>, %arg8: memref<96x16xf32, #tpu.memory_space<vmem>>, %arg9: memref<1x16xf32, #tpu.memory_space<vmem>>, %arg10: memref<4x16xf32, #tpu.memory_space<vmem>>) attributes {dimension_semantics = [#tpu.dimension_semantics<parallel>], iteration_bounds = array<i64: 1>, scalar_prefetch = 0 : i64, scratch_operands = 0 : i64, tpu.core_type = #tpu.core_type<tc>, window_params = [{transform_indices = @transform_0, window_bounds = array<i64: 4, 10>}, {pipeline_mode = #tpu.pipeline_mode<synchronous>, transform_indices = @transform_1, window_bounds = array<i64: 10, 32>}, {pipeline_mode = #tpu.pipeline_mode<synchronous>, transform_indices = @transform_2, window_bounds = array<i64: 1, 32>}, {pipeline_mode = #tpu.pipeline_mode<synchronous>, transform_indices = @transform_3, window_bounds = array<i64: 32, 32>}, {pipeline_mode = #tpu.pipeline_mode<synchronous>, transform_indices = @transform_4, window_bounds = array<i64: 1, 32>}, {pipeline_mode = #tpu.pipeline_mode<synchronous>, transform_indices = @transform_5, window_bounds = array<i64: 32, 96>}, {pipeline_mode = #tpu.pipeline_mode<synchronous>, transform_indices = @transform_6, window_bounds = array<i64: 1, 96>}, {pipeline_mode = #tpu.pipeline_mode<synchronous>, transform_indices = @transform_7, window_bounds = array<i64: 96, 16>}, {pipeline_mode = #tpu.pipeline_mode<synchronous>, transform_indices = @transform_8, window_bounds = array<i64: 1, 16>}, {transform_indices = @transform_9, window_bounds = array<i64: 4, 16>}]} {
    %c0 = arith.constant 0 : index
    %c0_0 = arith.constant 0 : index
    %0 = vector.load %arg1[%c0, %c0_0] : memref<4x10xf32, #tpu.memory_space<vmem>>, vector<4x10xf32>
    %c0_1 = arith.constant 0 : index
    %c0_2 = arith.constant 0 : index
    %1 = vector.load %arg2[%c0_1, %c0_2] : memref<10x32xf32, #tpu.memory_space<vmem>>, vector<10x32xf32>
    %cst = arith.constant dense<0.000000e+00> : vector<4x32xf32>
    %2 = tpu.matmul %0, %1, %cst {dimension_numbers = #tpu.dot_dimension_numbers<[1], [0], [0], [1], [0, 0, 1, 1], [], []>} : vector<4x10xf32>, vector<10x32xf32>, vector<4x32xf32> -> vector<4x32xf32>
    %c0_3 = arith.constant 0 : index
    %c0_4 = arith.constant 0 : index
    %3 = vector.load %arg3[%c0_3, %c0_4] : memref<1x32xf32, #tpu.memory_space<vmem>>, vector<1x32xf32>
    %4 = vector.broadcast %3 : vector<1x32xf32> to vector<4x32xf32>
    %5 = arith.addf %2, %4 : vector<4x32xf32>
    %cst_5 = arith.constant 0.000000e+00 : f32
    %6 = vector.broadcast %cst_5 : f32 to vector<4x32xf32>
    %7 = arith.maximumf %5, %6 : vector<4x32xf32>
    %c0_6 = arith.constant 0 : index
    %c0_7 = arith.constant 0 : index
    %8 = vector.load %arg4[%c0_6, %c0_7] : memref<32x32xf32, #tpu.memory_space<vmem>>, vector<32x32xf32>
    %cst_8 = arith.constant dense<0.000000e+00> : vector<4x32xf32>
    %9 = tpu.matmul %7, %8, %cst_8 {dimension_numbers = #tpu.dot_dimension_numbers<[1], [0], [0], [1], [0, 0, 1, 1], [], []>} : vector<4x32xf32>, vector<32x32xf32>, vector<4x32xf32> -> vector<4x32xf32>
    %c0_9 = arith.constant 0 : index
    %c0_10 = arith.constant 0 : index
    %10 = vector.load %arg5[%c0_9, %c0_10] : memref<1x32xf32, #tpu.memory_space<vmem>>, vector<1x32xf32>
    %11 = vector.broadcast %10 : vector<1x32xf32> to vector<4x32xf32>
    %12 = arith.addf %9, %11 : vector<4x32xf32>
    %cst_11 = arith.constant 0.000000e+00 : f32
    %13 = vector.broadcast %cst_11 : f32 to vector<4x32xf32>
    %14 = arith.maximumf %12, %13 : vector<4x32xf32>
    %c0_12 = arith.constant 0 : index
    %c0_13 = arith.constant 0 : index
    %15 = vector.load %arg6[%c0_12, %c0_13] : memref<32x96xf32, #tpu.memory_space<vmem>>, vector<32x96xf32>
    %cst_14 = arith.constant dense<0.000000e+00> : vector<4x96xf32>
    %16 = tpu.matmul %14, %15, %cst_14 {dimension_numbers = #tpu.dot_dimension_numbers<[1], [0], [0], [1], [0, 0, 1, 1], [], []>} : vector<4x32xf32>, vector<32x96xf32>, vector<4x96xf32> -> vector<4x96xf32>
    %c0_15 = arith.constant 0 : index
    %c0_16 = arith.constant 0 : index
    %17 = vector.load %arg7[%c0_15, %c0_16] : memref<1x96xf32, #tpu.memory_space<vmem>>, vector<1x96xf32>
    %18 = vector.broadcast %17 : vector<1x96xf32> to vector<4x96xf32>
    %19 = arith.addf %16, %18 : vector<4x96xf32>
    %cst_17 = arith.constant 0.000000e+00 : f32
    %20 = vector.broadcast %cst_17 : f32 to vector<4x96xf32>
    %21 = arith.maximumf %19, %20 : vector<4x96xf32>
    %c0_18 = arith.constant 0 : index
    %c0_19 = arith.constant 0 : index
    %22 = vector.load %arg8[%c0_18, %c0_19] : memref<96x16xf32, #tpu.memory_space<vmem>>, vector<96x16xf32>
    %cst_20 = arith.constant dense<0.000000e+00> : vector<4x16xf32>
    %23 = tpu.matmul %21, %22, %cst_20 {dimension_numbers = #tpu.dot_dimension_numbers<[1], [0], [0], [1], [0, 0, 1, 1], [], []>} : vector<4x96xf32>, vector<96x16xf32>, vector<4x16xf32> -> vector<4x16xf32>
    %c0_21 = arith.constant 0 : index
    %c0_22 = arith.constant 0 : index
    %24 = vector.load %arg9[%c0_21, %c0_22] : memref<1x16xf32, #tpu.memory_space<vmem>>, vector<1x16xf32>
    %25 = vector.broadcast %24 : vector<1x16xf32> to vector<4x16xf32>
    %26 = arith.addf %23, %25 : vector<4x16xf32>
    %27 = tpu.iota {dimensions = array<i32: 1>} : vector<4x16xi32>
    %cst_23 = arith.constant 0.000000e+00 : f32
    %28 = vector.broadcast %cst_23 : f32 to vector<4x16xf32>
    %c0_i32 = arith.constant 0 : i32
    %29 = vector.broadcast %c0_i32 : i32 to vector<4x16xi32>
    %30 = arith.cmpi sge, %27, %29 : vector<4x16xi32>
    %c5_i32 = arith.constant 5 : i32
    %31 = vector.broadcast %c5_i32 : i32 to vector<4x16xi32>
    %32 = arith.cmpi slt, %27, %31 : vector<4x16xi32>
    %33 = arith.andi %30, %32 : vector<4x16xi1>
    %cst_24 = arith.constant -1.000000e+30 : f32
    %34 = vector.broadcast %cst_24 : f32 to vector<4x16xf32>
    %35 = arith.select %33, %26, %34 : vector<4x16xi1>, vector<4x16xf32>
    %cst_25 = arith.constant dense<0xFF800000> : vector<4xf32>
    %36 = vector.multi_reduction <maximumf>, %35, %cst_25 [1] : vector<4x16xf32> to vector<4xf32>
    %37 = vector.shape_cast %36 : vector<4xf32> to vector<4x1xf32>
    %38 = vector.broadcast %37 : vector<4x1xf32> to vector<4x16xf32>
    %39 = arith.subf %35, %38 : vector<4x16xf32>
    %40 = math.exp %39 : vector<4x16xf32>
    %cst_26 = arith.constant 0.000000e+00 : f32
    %41 = vector.broadcast %cst_26 : f32 to vector<4x16xf32>
    %42 = arith.select %33, %40, %41 : vector<4x16xi1>, vector<4x16xf32>
    %cst_27 = arith.constant dense<0.000000e+00> : vector<4xf32>
    %43 = vector.multi_reduction <add>, %42, %cst_27 [1] : vector<4x16xf32> to vector<4xf32>
    %44 = vector.shape_cast %43 : vector<4xf32> to vector<4x1xf32>
    %45 = tpu.reciprocal %44 : vector<4x1xf32> -> vector<4x1xf32>
    %46 = vector.broadcast %45 : vector<4x1xf32> to vector<4x16xf32>
    %47 = arith.mulf %42, %46 : vector<4x16xf32>
    %cst_28 = arith.constant 9.99999974E-6 : f32
    %48 = vector.broadcast %cst_28 : f32 to vector<4x16xf32>
    %49 = arith.addf %47, %48 : vector<4x16xf32>
    %cst_29 = arith.constant 0.999949991 : f32
    %50 = vector.broadcast %cst_29 : f32 to vector<4x16xf32>
    %51 = arith.mulf %49, %50 : vector<4x16xf32>
    %52 = arith.select %33, %51, %28 : vector<4x16xi1>, vector<4x16xf32>
    %c5_i32_30 = arith.constant 5 : i32
    %53 = vector.broadcast %c5_i32_30 : i32 to vector<4x16xi32>
    %54 = arith.cmpi sge, %27, %53 : vector<4x16xi32>
    %c12_i32 = arith.constant 12 : i32
    %55 = vector.broadcast %c12_i32 : i32 to vector<4x16xi32>
    %56 = arith.cmpi slt, %27, %55 : vector<4x16xi32>
    %57 = arith.andi %54, %56 : vector<4x16xi1>
    %cst_31 = arith.constant -1.000000e+30 : f32
    %58 = vector.broadcast %cst_31 : f32 to vector<4x16xf32>
    %59 = arith.select %57, %26, %58 : vector<4x16xi1>, vector<4x16xf32>
    %cst_32 = arith.constant dense<0xFF800000> : vector<4xf32>
    %60 = vector.multi_reduction <maximumf>, %59, %cst_32 [1] : vector<4x16xf32> to vector<4xf32>
    %61 = vector.shape_cast %60 : vector<4xf32> to vector<4x1xf32>
    %62 = vector.broadcast %61 : vector<4x1xf32> to vector<4x16xf32>
    %63 = arith.subf %59, %62 : vector<4x16xf32>
    %64 = math.exp %63 : vector<4x16xf32>
    %cst_33 = arith.constant 0.000000e+00 : f32
    %65 = vector.broadcast %cst_33 : f32 to vector<4x16xf32>
    %66 = arith.select %57, %64, %65 : vector<4x16xi1>, vector<4x16xf32>
    %cst_34 = arith.constant dense<0.000000e+00> : vector<4xf32>
    %67 = vector.multi_reduction <add>, %66, %cst_34 [1] : vector<4x16xf32> to vector<4xf32>
    %68 = vector.shape_cast %67 : vector<4xf32> to vector<4x1xf32>
    %69 = tpu.reciprocal %68 : vector<4x1xf32> -> vector<4x1xf32>
    %70 = vector.broadcast %69 : vector<4x1xf32> to vector<4x16xf32>
    %71 = arith.mulf %66, %70 : vector<4x16xf32>
    %cst_35 = arith.constant 9.99999974E-6 : f32
    %72 = vector.broadcast %cst_35 : f32 to vector<4x16xf32>
    %73 = arith.addf %71, %72 : vector<4x16xf32>
    %cst_36 = arith.constant 9.999300e-01 : f32
    %74 = vector.broadcast %cst_36 : f32 to vector<4x16xf32>
    %75 = arith.mulf %73, %74 : vector<4x16xf32>
    %76 = arith.select %57, %75, %52 : vector<4x16xi1>, vector<4x16xf32>
    %c12_i32_37 = arith.constant 12 : i32
    %77 = vector.broadcast %c12_i32_37 : i32 to vector<4x16xi32>
    %78 = arith.cmpi sge, %27, %77 : vector<4x16xi32>
    %c16_i32 = arith.constant 16 : i32
    %79 = vector.broadcast %c16_i32 : i32 to vector<4x16xi32>
    %80 = arith.cmpi slt, %27, %79 : vector<4x16xi32>
    %81 = arith.andi %78, %80 : vector<4x16xi1>
    %cst_38 = arith.constant -1.000000e+30 : f32
    %82 = vector.broadcast %cst_38 : f32 to vector<4x16xf32>
    %83 = arith.select %81, %26, %82 : vector<4x16xi1>, vector<4x16xf32>
    %cst_39 = arith.constant dense<0xFF800000> : vector<4xf32>
    %84 = vector.multi_reduction <maximumf>, %83, %cst_39 [1] : vector<4x16xf32> to vector<4xf32>
    %85 = vector.shape_cast %84 : vector<4xf32> to vector<4x1xf32>
    %86 = vector.broadcast %85 : vector<4x1xf32> to vector<4x16xf32>
    %87 = arith.subf %83, %86 : vector<4x16xf32>
    %88 = math.exp %87 : vector<4x16xf32>
    %cst_40 = arith.constant 0.000000e+00 : f32
    %89 = vector.broadcast %cst_40 : f32 to vector<4x16xf32>
    %90 = arith.select %81, %88, %89 : vector<4x16xi1>, vector<4x16xf32>
    %cst_41 = arith.constant dense<0.000000e+00> : vector<4xf32>
    %91 = vector.multi_reduction <add>, %90, %cst_41 [1] : vector<4x16xf32> to vector<4xf32>
    %92 = vector.shape_cast %91 : vector<4xf32> to vector<4x1xf32>
    %93 = tpu.reciprocal %92 : vector<4x1xf32> -> vector<4x1xf32>
    %94 = vector.broadcast %93 : vector<4x1xf32> to vector<4x16xf32>
    %95 = arith.mulf %90, %94 : vector<4x16xf32>
    %cst_42 = arith.constant 9.99999974E-6 : f32
    %96 = vector.broadcast %cst_42 : f32 to vector<4x16xf32>
    %97 = arith.addf %95, %96 : vector<4x16xf32>
    %cst_43 = arith.constant 9.999600e-01 : f32
    %98 = vector.broadcast %cst_43 : f32 to vector<4x16xf32>
    %99 = arith.mulf %97, %98 : vector<4x16xf32>
    %100 = arith.select %81, %99, %76 : vector<4x16xi1>, vector<4x16xf32>
    %c0_44 = arith.constant 0 : index
    %c0_45 = arith.constant 0 : index
    %101 = vector.load %arg10[%c0_44, %c0_45] : memref<4x16xf32, #tpu.memory_space<vmem>>, vector<4x16xf32>
    tpu.vector_store %arg10[%c0_44, %c0_45], %100 {strides = array<i32>} : memref<4x16xf32, #tpu.memory_space<vmem>>, vector<4x16xf32>,
    return
  }
  func.func @transform_0(%arg0: i32) -> (i32, i32) {
    %c0_i32 = arith.constant 0 : i32
    %c0_i32_0 = arith.constant 0 : i32
    return %arg0, %c0_i32 : i32, i32
  }
  func.func @transform_1(%arg0: i32) -> (i32, i32) {
    %c0_i32 = arith.constant 0 : i32
    %c0_i32_0 = arith.constant 0 : i32
    %c0_i32_1 = arith.constant 0 : i32
    return %c0_i32, %c0_i32_0 : i32, i32
  }
  func.func @transform_2(%arg0: i32) -> (i32, i32) {
    %c0_i32 = arith.constant 0 : i32
    %c0_i32_0 = arith.constant 0 : i32
    %c0_i32_1 = arith.constant 0 : i32
    return %c0_i32, %c0_i32_0 : i32, i32
  }
  func.func @transform_3(%arg0: i32) -> (i32, i32) {
    %c0_i32 = arith.constant 0 : i32
    %c0_i32_0 = arith.constant 0 : i32
    %c0_i32_1 = arith.constant 0 : i32
    return %c0_i32, %c0_i32_0 : i32, i32
  }
  func.func @transform_4(%arg0: i32) -> (i32, i32) {
    %c0_i32 = arith.constant 0 : i32
    %c0_i32_0 = arith.constant 0 : i32
    %c0_i32_1 = arith.constant 0 : i32
    return %c0_i32, %c0_i32_0 : i32, i32
  }
  func.func @transform_5(%arg0: i32) -> (i32, i32) {
    %c0_i32 = arith.constant 0 : i32
    %c0_i32_0 = arith.constant 0 : i32
    %c0_i32_1 = arith.constant 0 : i32
    return %c0_i32, %c0_i32_0 : i32, i32
  }
  func.func @transform_6(%arg0: i32) -> (i32, i32) {
    %c0_i32 = arith.constant 0 : i32
    %c0_i32_0 = arith.constant 0 : i32
    %c0_i32_1 = arith.constant 0 : i32
    return %c0_i32, %c0_i32_0 : i32, i32
  }
  func.func @transform_7(%arg0: i32) -> (i32, i32) {
    %c0_i32 = arith.constant 0 : i32
    %c0_i32_0 = arith.constant 0 : i32
    %c0_i32_1 = arith.constant 0 : i32
    return %c0_i32, %c0_i32_0 : i32, i32
  }
  func.func @transform_8(%arg0: i32) -> (i32, i32) {
    %c0_i32 = arith.constant 0 : i32
    %c0_i32_0 = arith.constant 0 : i32
    %c0_i32_1 = arith.constant 0 : i32
    return %c0_i32, %c0_i32_0 : i32, i32
  }
  func.func @transform_9(%arg0: i32) -> (i32, i32) {
    %c0_i32 = arith.constant 0 : i32
    %c0_i32_0 = arith.constant 0 : i32
    return %arg0, %c0_i32 : i32, i32
  }
}

</mosaic_0001>

<bundles_post_ra>
// kernel: tpu_custom_call.1
= control target key start
LH: loop header
LB: loop body
LE: loop exit
PB: predicated region body
PF: predicated region fallthrough
CT: control target
= control target key end

     0   :  { %vm44_vm0 = vcmask 1041408   ;;  %vm40_vm1 = vcmask 80896   ;;  %s515_s0 = inlined_call_operand.vmem [shape: f32[4,10], index: 0, kind: input, shape index: {}]   ;;  %s516_s1 = inlined_call_operand.vmem [shape: f32[10,32], index: 1, kind: input, shape index: {}]   ;;  %s517_s2 = inlined_call_operand.vmem [shape: f32[1,32], index: 2, kind: input, shape index: {}]   ;;  %s518_s3 = inlined_call_operand.vmem [shape: f32[32,32], index: 3, kind: input, shape index: {}]   ;;  %s519_s4 = inlined_call_operand.vmem [shape: f32[1,32], index: 4, kind: input, shape index: {}]   ;;  %s520_s5 = inlined_call_operand.vmem [shape: f32[32,96], index: 5, kind: input, shape index: {}]   ;;  %s521_s6 = inlined_call_operand.vmem [shape: f32[1,96], index: 6, kind: input, shape index: {}]   ;;  %s522_s7 = inlined_call_operand.vmem [shape: f32[96,16], index: 7, kind: input, shape index: {}]   ;;  %s523_s8 = inlined_call_operand.vmem [shape: f32[1,16], index: 8, kind: input, shape index: {}]   ;;  %s524_s9 = inlined_call_operand.hbm [shape: f32[4,16], index: 9, kind: output, shape index: {}]  }
   0x1   :  { %v35_v0 = vld [vmem:[%s516_s1 + $0x8] sm:$0x3]  ;;  %v34_v1 = vld [vmem:[%s516_s1] sm:$0xff]  ;;  %v72_v3 = vld [vmem:[%s518_s3 + $0x18] sm:$0xff] }
   0x2   :  { %290 = vmatpush.msk.msra.mxu0 %vm44_vm0, %v35_v0  ;;  %v33_v2 = vld [vmem:[%s515_s0] sm:$0xf]  ;;  %93 = vmatpush.msra.mxu1 %v72_v3 }
   0x4   :  { %63 = vmatpush.msra.mxu0 %v34_v1 }
   0x5   :  { %14 = vsyncpa [#allocation3], 0  ;;  %291 = vmatmul.msk.f32.vlgmr.msra.gmra.mxu0 %vm40_vm1, %v33_v2  ;;  %v71_v4 = vld [vmem:[%s518_s3 + $0x10] sm:$0xff]  ;;  %v70_v5 = vld [vmem:[%s518_s3 + $0x8] sm:$0xff]  ;;  %vm77_vm2 = vcmask 261120   ;;  %vm150_vm3 = vcmask 785408   ;;  %v174_v35 = vlaneseq }
   0x6   :  { %94 = vmatpush.msra.mxu1 %v71_v4  ;;  %v69_v6 = vld [vmem:[%s518_s3] sm:$0xff]  ;;  %v105_v7 = vld [vmem:[%s520_s5 + $0x18] sm:$0xff]  ;;  %v104_v12 = vld [vmem:[%s520_s5 + $0x10] sm:$0xff]  ;;  %vm180_vm8 = vcmask 125952   ;;  %s281_s12 = sshll.u32 %s524_s9, 4  ;;  %s282_s12 = int_to_ptr.hbm [resolvable:$true] %s281_s12 }
   0x7   :  { %125 = vmatpush.msra.mxu2 %v105_v7  ;;  %v296_v8 = vld [vmem:[%s517_s2] ss:$0 sm:$0xff]  ;;  %v103_v13 = vld [vmem:[%s520_s5 + $0x8] sm:$0xff]  ;;  %v145_v15 = vld [vmem:[%s522_s7 + $0x58] sm:$0xff]  ;;  %v469_v36 = vand.u32 127, %v174_v35 }
   0x8   :  { %95 = vmatpush.msra.mxu1 %v70_v5  ;;  %v102_v14 = vld [vmem:[%s520_s5] sm:$0xff]  ;;  %v144_v16 = vld [vmem:[%s522_s7 + $0x50] sm:$0xff]  ;;  %158 = vmatpush.msra.mxu3 %v145_v15  ;;  %v143_v17 = vld [vmem:[%s522_s7 + $0x48] sm:$0xff] }
   0x9   :  { %126 = vmatpush.msra.mxu2 %v104_v12  ;;  %v142_v18 = vld [vmem:[%s522_s7 + $0x40] sm:$0xff]  ;;  %v141_v19 = vld [vmem:[%s522_s7 + $0x38] sm:$0xff]  ;;  %v140_v20 = vld [vmem:[%s522_s7 + $0x30] sm:$0xff]  ;;  %vm241_vm4 = vcmp.ge.s32.totalorder %v469_v36, 12  ;;  %vm242_vm5 = vcmp.lt.s32.totalorder %v469_v36, 16  ;;  %vm177_vm7 = vcmp.lt.s32.totalorder %v469_v36, 5 }
   0xa   :  { %96 = vmatpush.msra.mxu1 %v69_v6  ;;  %159 = vmatpush.msra.mxu3 %v144_v16  ;;  %v139_v21 = vld [vmem:[%s522_s7 + $0x28] sm:$0xff]  ;;  %v138_v22 = vld [vmem:[%s522_s7 + $0x20] sm:$0xff]  ;;  %v137_v23 = vld [vmem:[%s522_s7 + $0x18] sm:$0xff]  ;;  %vm209_vm9 = vcmp.ge.s32.totalorder %v469_v36, 5  ;;  %vm210_vm10 = vcmp.lt.s32.totalorder %v469_v36, 12 }
   0xb   :  { %127 = vmatpush.msra.mxu2 %v103_v13  ;;  %v297_v24 = vld [vmem:[%s519_s4] ss:$0 sm:$0xff]  ;;  %v136_v28 = vld [vmem:[%s522_s7 + $0x10] sm:$0xff]  ;;  %v135_v29 = vld [vmem:[%s522_s7 + $0x8] sm:$0xff] }
   0xc   :  { %160 = vmatpush.msra.mxu3 %v143_v17  ;;  %v134_v30 = vld [vmem:[%s522_s7] sm:$0xff]  ;;  %vm476_vm6 = vmand %vm241_vm4, %vm242_vm5 }
   0xd   :  { %128 = vmatpush.msra.mxu2 %v102_v14  ;;  %v298_v31 = vld [vmem:[%s521_s6] ss:$0 sm:$0xff]  ;;  %vm489_vm11 = vmand %vm209_vm9, %vm210_vm10  ;;  %s338_s6 = smov [#allocation2]  }
   0xe   :  { %161 = vmatpush.msra.mxu3 %v142_v18  ;;  %v299_v37 = vld [vmem:[%s523_s8] ss:$0 sm:$0xff]  ;;  %s279_s7 = sshll.u32 %s338_s6, 4  ;;  %s280_s7 = int_to_ptr.vmem [resolvable:$true] %s279_s7 }
  0x10   :  { %162 = vmatpush.msra.mxu3 %v141_v19 }
  0x12   :  { %163 = vmatpush.msra.mxu3 %v140_v20 }
  0x14   :  { %164 = vmatpush.msra.mxu3 %v139_v21 }
  0x16   :  { %165 = vmatpush.msra.mxu3 %v138_v22 }
  0x18   :  { %166 = vmatpush.msra.mxu3 %v137_v23 }
  0x1a   :  { %167 = vmatpush.msra.mxu3 %v136_v28 }
  0x1c   :  { %168 = vmatpush.msra.mxu3 %v135_v29 }
  0x1e   :  { %169 = vmatpush.msra.mxu3 %v134_v30 }
  0x82   :  { %v65_v9 = vpop.f32.mrf.mxu0 }
  0x83   :  { %v66_v10 = vadd.f32 %v296_v8, %v65_v9 }
  0x85   :  { %v68_v11 = vmax.f32 %v66_v10, 0.0 }
  0x87   :  { %292 = vmatmul.msk.f32.vlgmr.msra.gmra.mxu1 %vm77_vm2, %v68_v11 }
 0x104   :  { %v98_v25 = vpop.f32.mrf.mxu1 }
 0x105   :  { %v99_v26 = vadd.f32 %v297_v24, %v98_v25 }
 0x107   :  { %v101_v27 = vmax.f32 %v99_v26, 0.0 }
 0x109   :  { %293 = vmatmul.msk.f32.vlgmr.msra.gmra.mxu2 %vm77_vm2, %v101_v27 }
 0x18c   :  { %v130_v32 = vpop.f32.mrf.mxu2 }
 0x18d   :  { %v131_v33 = vadd.f32 %v298_v31, %v130_v32 }
 0x18f   :  { %v133_v34 = vmax.f32 %v131_v33, 0.0 }
 0x191   :  { %294 = vmatmul.msk.f32.vlgmr.msra.gmra.mxu3 %vm150_vm3, %v133_v34 }
 0x214   :  { %v171_v38 = vpop.f32.mrf.mxu3 }
 0x215   :  { %v172_v40 = vadd.f32 %v299_v37, %v171_v38 }
 0x217   :  { %v244_v41 = vsel %vm476_vm6, %v172_v40, -1e+30  ;;  %v179_v42 = vsel %vm177_vm7, %v172_v40, -1e+30  ;;  %v212_v46 = vsel %vm489_vm11, %v172_v40, -1e+30 }
 0x218   :  { %v245_v43 = vsel %vm180_vm8, %v244_v41, -inf  ;;  %v181_v44 = vsel %vm180_vm8, %v179_v42, -inf  ;;  %v213_v47 = vsel %vm180_vm8, %v212_v46, -inf }
 0x219   :  { %246 = vmax.xlane.f32.xlu1 %v245_v43  ;;  %182 = vmax.xlane.f32.xlu0 %v181_v44 }
 0x221   :  { %214 = vmax.xlane.f32.xlu0 %v213_v47 }
 0x28c   :  { %v183_v48 = vpop.xlane.xlu0 %182  ;;  %v247_v51 = vpop.xlane.xlu1 %246 }
 0x28d   :  { %v184_v49 = vsub.f32 %v179_v42, %v183_v48  ;;  %v248_v53 = vsub.f32 %v244_v41, %v247_v51 }
 0x28f   :  { %v185_v50 = vmul.f32 1.442695, %v184_v49  ;;  %v249_v57 = vmul.f32 1.442695, %v248_v53 }
 0x291   :  { %300 = vpow2.f32 %v185_v50 }
 0x294   :  { %v215_v52 = vpop.xlane.xlu0 %214 }
 0x295   :  { %v216_v54 = vsub.f32 %v212_v46, %v215_v52 }
 0x297   :  { %v217_v55 = vmul.f32 1.442695, %v216_v54  ;;  %v301_v56 = vpop.eup %300 }
 0x298   :  { %v187_v58 = vsel %vm177_vm7, %v301_v56, 0.0 }
 0x299   :  { %302 = vpow2.f32 %v217_v55  ;;  %v188_v59 = vsel %vm180_vm8, %v187_v58, 0.0 }
 0x29a   :  { %189 = vadd.xlane.f32.xlu1 %v188_v59  ;;  %304 = vpow2.f32 %v249_v57 }
 0x29f   :  { %v303_v60 = vpop.eup %302 }
 0x2a0   :  { %v219_v61 = vsel %vm489_vm11, %v303_v60, 0.0  ;;  %v305_v63 = vpop.eup %304 }
 0x2a1   :  { %v220_v62 = vsel %vm180_vm8, %v219_v61, 0.0  ;;  %v251_v0 = vsel %vm476_vm6, %v305_v63, 0.0 }
 0x2a2   :  { %221 = vadd.xlane.f32.xlu2 %v220_v62  ;;  %v252_v1 = vsel %vm180_vm8, %v251_v0, 0.0 }
 0x2aa   :  { %253 = vadd.xlane.f32.xlu2 %v252_v1 }
 0x30d   :  { %v190_v2 = vpop.xlane.xlu1 %189 }
 0x30e   :  { %306 = vrcp.f32 %v190_v2  ;;  %v202_v12 = vand.u32 2147483648, %v190_v2  ;;  %vm196_vm13 = vweird.f32 %v190_v2  ;;  %v200_v13 = vand.u32 2147483647, %v190_v2 }
 0x310   :  { %v203_v19 = vor.u32 1.1754944e-38, %v202_v12  ;;  %vm201_vm0 = vcmp.eq.f32.partialorder %v200_v13, 8.507059e+37 }
 0x314   :  { %v307_v3 = vpop.eup %306 }
 0x315   :  { %v222_v4 = vpop.xlane.xlu2 %221  ;;  %v192_v5 = vmul.f32 %v307_v3, %v190_v2  ;;  %vm197_vm12 = vweird.f32 %v307_v3 }
 0x316   :  { %308 = vrcp.f32 %v222_v4  ;;  %vm198_vm14 = vmor %vm196_vm13, %vm197_vm12  ;;  %v234_v15 = vand.u32 2147483648, %v222_v4  ;;  %v232_v18 = vand.u32 2147483647, %v222_v4  ;;  %vm228_vm1 = vweird.f32 %v222_v4 }
 0x317   :  { %v193_v6 = vsub.f32 1.0, %v192_v5 }
 0x318   :  { %v235_v23 = vor.u32 1.1754944e-38, %v234_v15  ;;  %vm233_vm3 = vcmp.eq.f32.partialorder %v232_v18, 8.507059e+37 }
 0x319   :  { %v194_v7 = vmul.f32 %v307_v3, %v193_v6 }
 0x31b   :  { %v195_v9 = vadd.f32 %v307_v3, %v194_v7 }
 0x31c   :  { %v309_v8 = vpop.eup %308 }
 0x31d   :  { %v224_v10 = vmul.f32 %v309_v8, %v222_v4  ;;  %v254_v11 = vpop.xlane.xlu2 %253  ;;  %v199_v16 = vsel %vm198_vm14, %v307_v3, %v195_v9  ;;  %vm229_vm15 = vweird.f32 %v309_v8 }
 0x31e   :  { %310 = vrcp.f32 %v254_v11  ;;  %v204_v22 = vsel %vm201_vm0, %v203_v19, %v199_v16  ;;  %vm230_vm2 = vmor %vm228_vm1, %vm229_vm15  ;;  %v266_v29 = vand.u32 2147483648, %v254_v11  ;;  %v264_v32 = vand.u32 2147483647, %v254_v11 }
 0x31f   :  { %v225_v14 = vsub.f32 1.0, %v224_v10  ;;  %v205_v27 = vmul.f32 %v204_v22, %v187_v58  ;;  %vm260_vm5 = vweird.f32 %v254_v11 }
 0x320   :  { %v267_v35 = vor.u32 1.1754944e-38, %v266_v29  ;;  %vm265_vm10 = vcmp.eq.f32.partialorder %v264_v32, 8.507059e+37 }
 0x321   :  { %v226_v17 = vmul.f32 %v309_v8, %v225_v14  ;;  %v206_v33 = vadd.f32 1e-05, %v205_v27 }
 0x323   :  { %v227_v20 = vadd.f32 %v309_v8, %v226_v17  ;;  %v207_v41 = vmul.f32 0.99995, %v206_v33 }
 0x324   :  { %v311_v21 = vpop.eup %310 }
 0x325   :  { %v231_v24 = vsel %vm230_vm2, %v309_v8, %v227_v20  ;;  %v256_v25 = vmul.f32 %v311_v21, %v254_v11  ;;  %vm261_vm4 = vweird.f32 %v311_v21  ;;  %v208_v46 = vsel %vm177_vm7, %v207_v41, 0.0 }
 0x326   :  { %v236_v26 = vsel %vm233_vm3, %v235_v23, %v231_v24  ;;  %vm262_vm9 = vmor %vm260_vm5, %vm261_vm4 }
 0x327   :  { %v257_v28 = vsub.f32 1.0, %v256_v25  ;;  %v237_v30 = vmul.f32 %v236_v26, %v219_v61 }
 0x329   :  { %v258_v31 = vmul.f32 %v311_v21, %v257_v28  ;;  %v238_v37 = vadd.f32 1e-05, %v237_v30 }
 0x32b   :  { %v259_v34 = vadd.f32 %v311_v21, %v258_v31  ;;  %v239_v43 = vmul.f32 0.99993, %v238_v37 }
 0x32d   :  { %v263_v38 = vsel %vm262_vm9, %v311_v21, %v259_v34  ;;  %v240_v48 = vsel %vm489_vm11, %v239_v43, %v208_v46 }
 0x32e   :  { %v268_v40 = vsel %vm265_vm10, %v267_v35, %v263_v38 }
 0x32f   :  { %v269_v42 = vmul.f32 %v268_v40, %v251_v0 }
 0x331   :  { %v270_v44 = vadd.f32 1e-05, %v269_v42 }
 0x333   :  { %v271_v47 = vmul.f32 0.99996, %v270_v44 }
 0x335   :  { %v272_v49 = vsel %vm476_vm6, %v271_v47, %v240_v48 }
 0x336   :  { %273 = vst.msk [vmem:[#allocation2] sm:$0xf] %vm180_vm8, %v272_v49 }
 0x337   :  { %284 = dma.vmem_to_hbm [thread:$0]  %s280_s7, 64, %s282_s12, [#allocation3]  }
 0x338   :  { %336 = dma.done.wait [#allocation3], 64  }
 0x339   :  { %337 = vsyncadd [#allocation3], 4294967232 }
 0x33a   :  { %289 = vsyncpa [#allocation3], 1 }

</bundles_post_ra>
